<compile_context>
chip_gen: v7x
topology: tpu7x:2x2x1
jax: 0.10.0
libtpu: 0.0.40
codegen_flags: <defaults>
</compile_context>

<pallas_src>
import functools

import jax
import jax.numpy as jnp
from jax.experimental import pallas as pl
from jax.experimental.pallas import tpu as pltpu


_LANE = 128          # lane width: feature dims padded to multiples of this
_SUBLANE = 8         # f32 sublane granularity for row tiles


def _round_up(n, m):
    return ((n + m - 1) // m) * m


def _vmem_capacity_bytes():
    try:
        return int(pltpu.get_tpu_info().vmem_capacity_bytes)
    except Exception:
        # Conservative default (v7x per-TC VMEM) if the query is unavailable.
        return 64 * 1024 * 1024


_VMEM_CAP = _vmem_capacity_bytes()
# Scoped VMEM limit handed to the compiler, and the budget we size our own
# resident data against (leave headroom for compiler scratch / pipeline bufs).
# On v7x the capacity is per-TensorCore, so with a "parallel" M axis each core
# holds its own copy of the resident weights -- budgeting per-TC is correct.
_VMEM_LIMIT = max(32 * 1024 * 1024, min(int(_VMEM_CAP * 0.80), 100 * 1024 * 1024))
_FUSED_VMEM_BUDGET = max(24 * 1024 * 1024, int(_VMEM_CAP * 0.65))


def _choose_tile(dim_pad, desired, granule):
    """Largest multiple of `granule` that is <= desired and divides dim_pad."""
    t = min(desired, dim_pad)
    t = max(granule, (t // granule) * granule)
    while dim_pad % t != 0:
        t -= granule
    return t


# ---------------------------------------------------------------------------
# Parameter preparation: pad once, reuse on every forward call.
# ---------------------------------------------------------------------------
def prepare_mlp_params(params):
    """params: list of (w, b) with w shaped (in, out).  Pads feature dims to
    multiples of 128 exactly once and caches the padded copies."""
    padded, dims = [], []
    for (w, b) in params:
        kin, nout = w.shape
        kp, np_ = _round_up(kin, _LANE), _round_up(nout, _LANE)
        w_p = jnp.zeros((kp, np_), w.dtype).at[:kin, :nout].set(w)
        b_p = jnp.zeros((1, np_), b.dtype).at[0, :nout].set(b)
        padded.append((w_p, b_p))
        dims.append((kin, nout))
    return {"padded": padded, "dims": dims}


# ---------------------------------------------------------------------------
# Fused multi-layer kernel: one grid step = one row tile through ALL layers.
# Weights/biases are VMEM-resident (single-buffered); activations never leave
# VMEM/vregs between layers.
# ---------------------------------------------------------------------------
def _fused_mlp_kernel(*refs, num_layers):
    # refs = (x_ref, w0, b0, w1, b1, ..., o_ref)
    x_ref = refs[0]
    o_ref = refs[-1]
    y = x_ref[...]
    for i in range(num_layers):
        w_ref = refs[1 + 2 * i]
        b_ref = refs[2 + 2 * i]
        lhs = y if y.dtype == w_ref.dtype else y.astype(w_ref.dtype)
        y = jnp.dot(lhs, w_ref[...], preferred_element_type=jnp.float32)
        y = y + b_ref[...].astype(jnp.float32)
        if i < num_layers - 1:
            y = jnp.maximum(y, 0.0)
    o_ref[...] = y.astype(o_ref.dtype)


def _fused_vmem_bytes(tm, k0_pad, prepared, act_dtype):
    """Estimated resident VMEM for the fused path at row-tile tm."""
    itemsize = jnp.dtype(act_dtype).itemsize
    padded = prepared["padded"]
    # Weights/biases: single-buffered (pl.Buffered(1)), resident across grid.
    w_bytes = sum(int(w.size) * w.dtype.itemsize + int(b.size) * b.dtype.itemsize
                  for w, b in padded)
    pads_out = [w.shape[1] for w, _ in padded]
    n_last_pad = pads_out[-1]
    # Input / output tiles: double-buffered by the pipeline.
    io_bytes = 2 * tm * k0_pad * itemsize + 2 * tm * n_last_pad * itemsize
    # f32 intermediate activations staged in VMEM/vregs (~2 live tensors).
    inter_bytes = 2 * tm * max([k0_pad] + pads_out) * 4
    return w_bytes + io_bytes + inter_bytes


_TM_CANDIDATES = (1024, 512, 256, 128, 64, 32, 16, 8)


def _select_fused_tm(m, k0_pad, prepared, act_dtype):
    """Largest row tile that fits the per-core VMEM budget, or None."""
    m_pad = _round_up(m, _SUBLANE)
    for tm in _TM_CANDIDATES:
        if _fused_vmem_bytes(min(tm, m_pad), k0_pad, prepared, act_dtype) \
                <= _FUSED_VMEM_BUDGET:
            tm_eff = _choose_tile(m_pad, tm, _SUBLANE)
            # v7x megacore: make sure the "parallel" M axis has >= 2 tiles so
            # both TensorCores get work (no-op cost on single-core v5e/v6e).
            if m_pad // tm_eff < 2 and m_pad >= 2 * _SUBLANE:
                tm_eff = _choose_tile(m_pad, max(_SUBLANE, m_pad // 2), _SUBLANE)
            return tm_eff
    return None


def pallas_mlp_fused(x2d, prepared, *, tm):
    """x2d: (M, K0).  Returns padded output (M_pad, N_last_pad)."""
    M, K0 = x2d.shape
    dtype = x2d.dtype
    padded = prepared["padded"]
    num_layers = len(padded)
    K0_pad = padded[0][0].shape[0]
    N_last_pad = padded[-1][0].shape[1]

    M_pad = _round_up(M, _SUBLANE)
    assert M_pad % tm == 0
    if (M, K0) != (M_pad, K0_pad):
        x_p = jnp.zeros((M_pad, K0_pad), dtype).at[:M, :K0].set(x2d)
    else:
        x_p = x2d

    operands = [x_p]
    in_specs = [pl.BlockSpec((tm, K0_pad), lambda i: (i, 0))]
    for (w_p, b_p) in padded:
        kp, np_ = w_p.shape
        operands += [w_p, b_p]
        # Constant index_map => VMEM-resident; single-buffer to halve footprint.
        in_specs.append(pl.BlockSpec((kp, np_), lambda i: (0, 0),
                                     pipeline_mode=pl.Buffered(1)))
        in_specs.append(pl.BlockSpec((1, np_), lambda i: (0, 0),
                                     pipeline_mode=pl.Buffered(1)))

    itemsize = jnp.dtype(dtype).itemsize
    flops = 2 * M_pad * sum(w.shape[0] * w.shape[1] for w, _ in padded)
    bytes_accessed = (int(x_p.size) * itemsize
                      + sum(int(w.size) * w.dtype.itemsize
                            + int(b.size) * b.dtype.itemsize for w, b in padded)
                      + M_pad * N_last_pad * itemsize)

    kernel = functools.partial(_fused_mlp_kernel, num_layers=num_layers)
    out = pl.pallas_call(
        kernel,
        out_shape=jax.ShapeDtypeStruct((M_pad, N_last_pad), dtype),
        grid_spec=pltpu.PrefetchScalarGridSpec(
            num_scalar_prefetch=0,
            grid=(M_pad // tm,),
            in_specs=in_specs,
            out_specs=pl.BlockSpec((tm, N_last_pad), lambda i: (i, 0)),
        ),
        compiler_params=pltpu.CompilerParams(
            dimension_semantics=("parallel",),
            vmem_limit_bytes=_VMEM_LIMIT,
        ),
        cost_estimate=pl.CostEstimate(
            flops=flops, transcendentals=0, bytes_accessed=bytes_accessed),
    )(*operands)
    return out


# ---------------------------------------------------------------------------
# Fallback: per-layer Linear(+ReLU) tiled over (M, N, K) with f32 accumulator.
# Used only when the fused kernel's resident weights would not fit in VMEM.
# ---------------------------------------------------------------------------
def _tiled_linear_kernel(x_ref, w_ref, b_ref, o_ref, acc_ref, *, apply_relu):
    k = pl.program_id(2)

    @pl.when(k == 0)
    def _():
        acc_ref[...] = jnp.zeros_like(acc_ref)

    acc_ref[...] += jnp.dot(x_ref[...], w_ref[...],
                            preferred_element_type=jnp.float32)

    @pl.when(k == pl.num_programs(2) - 1)
    def _():
        y = acc_ref[...] + b_ref[...].astype(jnp.float32)
        if apply_relu:
            y = jnp.maximum(y, 0.0)
        o_ref[...] = y.astype(o_ref.dtype)


def pallas_linear_tiled(x2d, w_p, b_p, *, apply_relu, tm=512, tn=512, tk=1024):
    """x2d: (M, K) with K <= K_pad; w_p: (K_pad, N_pad), b_p: (1, N_pad) are
    PRE-PADDED (multiples of 128).  Returns padded output (M_pad, N_pad)."""
    M, K = x2d.shape
    K_pad, N_pad = w_p.shape
    dtype = x2d.dtype

    M_pad = _round_up(M, _SUBLANE)
    if (M, K) != (M_pad, K_pad):
        x_p = jnp.zeros((M_pad, K_pad), dtype).at[:M, :K].set(x2d)
    else:
        x_p = x2d

    # Tiles divide the (lane/sublane-) padded dims -> no tile-rounding waste.
    tm_eff = _choose_tile(M_pad, tm, _SUBLANE)
    tk_eff = _choose_tile(K_pad, tk, _LANE)
    tn_eff = _choose_tile(N_pad, tn, _LANE)

    itemsize = jnp.dtype(dtype).itemsize
    flops = 2 * M_pad * K_pad * N_pad
    bytes_accessed = (int(x_p.size) * itemsize
                      + int(w_p.size) * w_p.dtype.itemsize
                      + int(b_p.size) * b_p.dtype.itemsize
                      + M_pad * N_pad * itemsize)

    kernel = functools.partial(_tiled_linear_kernel, apply_relu=apply_relu)
    out = pl.pallas_call(
        kernel,
        out_shape=jax.ShapeDtypeStruct((M_pad, N_pad), dtype),
        grid_spec=pltpu.PrefetchScalarGridSpec(
            num_scalar_prefetch=0,
            grid=(M_pad // tm_eff, N_pad // tn_eff, K_pad // tk_eff),
            in_specs=[
                pl.BlockSpec((tm_eff, tk_eff), lambda i, j, k: (i, k)),
                pl.BlockSpec((tk_eff, tn_eff), lambda i, j, k: (k, j)),
                pl.BlockSpec((1, tn_eff), lambda i, j, k: (0, j)),
            ],
            out_specs=pl.BlockSpec((tm_eff, tn_eff), lambda i, j, k: (i, j)),
            scratch_shapes=[pltpu.VMEM((tm_eff, tn_eff), jnp.float32)],
        ),
        compiler_params=pltpu.CompilerParams(
            dimension_semantics=("parallel", "parallel", "arbitrary"),
            vmem_limit_bytes=_VMEM_LIMIT,
        ),
        cost_estimate=pl.CostEstimate(
            flops=flops, transcendentals=0, bytes_accessed=bytes_accessed),
    )(x_p, w_p, b_p)
    return out


# ---------------------------------------------------------------------------
# Module-level forward / params / reference
# ---------------------------------------------------------------------------
def mlp_forward(x, prepared, *, force_layerwise=False):
    """x: (batch, seq, input_dim) -> (batch, seq, output_dim)."""
    B, S, D = x.shape
    x2d = x.reshape(B * S, D)
    M = x2d.shape[0]
    n_out = prepared["dims"][-1][1]
    K0_pad = prepared["padded"][0][0].shape[0]

    tm = None if force_layerwise else _select_fused_tm(M, K0_pad, prepared, x2d.dtype)
    if tm is not None:
        y2d = pallas_mlp_fused(x2d, prepared, tm=tm)
    else:
        # TODO(synk): for MLPs too wide for the weight-resident fused path, add a
        # weight-streaming fused variant (pltpu.emit_pipeline over (K,N) weight
        # tiles with VMEM-resident activations) instead of per-layer HBM round-trips.
        y2d = x2d
        nl = len(prepared["padded"])
        for i, (w_p, b_p) in enumerate(prepared["padded"]):
            y2d = pallas_linear_tiled(y2d, w_p, b_p, apply_relu=(i < nl - 1))
    return y2d[:M, :n_out].reshape(B, S, n_out)


def init_mlp_params(key, input_dim, hidden_dim, output_dim, num_layers,
                    dtype=jnp.float32):
    """Matches PyTorch nn.Linear default init (uniform +-1/sqrt(fan_in)).
    Weights are stored as (in, out) for row-major matmul inside the kernel."""
    h = [hidden_dim] * (num_layers - 1)
    dims = list(zip([input_dim] + h, h + [output_dim]))
    params = []
    for (n_in, n_out) in dims:
        key, kw, kb = jax.random.split(key, 3)
        bound = 1.0 / (n_in ** 0.5)
        w = jax.random.uniform(kw, (n_in, n_out), dtype, minval=-bound, maxval=bound)
        b = jax.random.uniform(kb, (n_out,), dtype, minval=-bound, maxval=bound)
        params.append((w, b))
    return params


def mlp_reference(x, params):
    B, S, D = x.shape
    y = x.reshape(B * S, D)
    for i, (w, b) in enumerate(params):
        y = y @ w + b
        if i < len(params) - 1:
            y = jnp.maximum(y, 0.0)
    return y.reshape(B, S, -1)


if __name__ == "__main__":
    # Small shapes consistent with an MLP head: batch=2, seq=8,
    # input_dim=32, hidden_dim=32, output_dim=16, num_layers=3.
    batch, seq = 2, 8
    input_dim, hidden_dim, output_dim, num_layers = 32, 32, 16, 3

    key = jax.random.PRNGKey(0)
    kx, kp = jax.random.split(key)
    x = jax.random.normal(kx, (batch, seq, input_dim), dtype=jnp.float32)
    params = init_mlp_params(kp, input_dim, hidden_dim, output_dim, num_layers)
    prepared = prepare_mlp_params(params)   # pad parameters ONCE

    ref = mlp_reference(x, params)

    # Fused single-kernel path (default).
    out_fused = jax.block_until_ready(mlp_forward(x, prepared))
    assert out_fused.shape == (batch, seq, output_dim)
    assert jnp.allclose(out_fused, ref, atol=1e-4, rtol=1e-5), "fused mismatch vs reference"

    # Layer-wise (M, N, K)-tiled fallback path (used for very large widths).
    out_tiled = jax.block_until_ready(mlp_forward(x, prepared, force_layerwise=True))
    assert out_tiled.shape == (batch, seq, output_dim)
    assert jnp.allclose(out_tiled, ref, atol=1e-4, rtol=1e-5), "tiled mismatch vs reference"

    print("KERNEL_OK")
</pallas_src>

<mosaic_0001>
module attributes {stable_mosaic.version = 11 : i64} {
  func.func @_fused_mlp_kernel(%arg0: i32, %arg1: memref<8x128xf32, #tpu.memory_space<vmem>>, %arg2: memref<128x128xf32, #tpu.memory_space<vmem>>, %arg3: memref<1x128xf32, #tpu.memory_space<vmem>>, %arg4: memref<128x128xf32, #tpu.memory_space<vmem>>, %arg5: memref<1x128xf32, #tpu.memory_space<vmem>>, %arg6: memref<128x128xf32, #tpu.memory_space<vmem>>, %arg7: memref<1x128xf32, #tpu.memory_space<vmem>>, %arg8: memref<8x128xf32, #tpu.memory_space<vmem>>) attributes {dimension_semantics = [#tpu.dimension_semantics<parallel>], iteration_bounds = array<i64: 2>, scalar_prefetch = 0 : i64, scratch_operands = 0 : i64, tpu.core_type = #tpu.core_type<tc>, window_params = [{transform_indices = @transform_0, window_bounds = array<i64: 8, 128>}, {pipeline_mode = #tpu.pipeline_mode<synchronous>, transform_indices = @transform_1, window_bounds = array<i64: 128, 128>}, {pipeline_mode = #tpu.pipeline_mode<synchronous>, transform_indices = @transform_2, window_bounds = array<i64: 1, 128>}, {pipeline_mode = #tpu.pipeline_mode<synchronous>, transform_indices = @transform_3, window_bounds = array<i64: 128, 128>}, {pipeline_mode = #tpu.pipeline_mode<synchronous>, transform_indices = @transform_4, window_bounds = array<i64: 1, 128>}, {pipeline_mode = #tpu.pipeline_mode<synchronous>, transform_indices = @transform_5, window_bounds = array<i64: 128, 128>}, {pipeline_mode = #tpu.pipeline_mode<synchronous>, transform_indices = @transform_6, window_bounds = array<i64: 1, 128>}, {transform_indices = @transform_7, window_bounds = array<i64: 8, 128>}]} {
    %c0 = arith.constant 0 : index
    %c0_0 = arith.constant 0 : index
    %0 = vector.load %arg1[%c0, %c0_0] : memref<8x128xf32, #tpu.memory_space<vmem>>, vector<8x128xf32>
    %c0_1 = arith.constant 0 : index
    %c0_2 = arith.constant 0 : index
    %1 = vector.load %arg2[%c0_1, %c0_2] : memref<128x128xf32, #tpu.memory_space<vmem>>, vector<128x128xf32>
    %cst = arith.constant dense<0.000000e+00> : vector<8x128xf32>
    %2 = tpu.matmul %0, %1, %cst {dimension_numbers = #tpu.dot_dimension_numbers<[1], [0], [0], [1], [0, 0, 1, 1], [], []>} : vector<8x128xf32>, vector<128x128xf32>, vector<8x128xf32> -> vector<8x128xf32>
    %c0_3 = arith.constant 0 : index
    %c0_4 = arith.constant 0 : index
    %3 = vector.load %arg3[%c0_3, %c0_4] : memref<1x128xf32, #tpu.memory_space<vmem>>, vector<1x128xf32>
    %4 = vector.broadcast %3 : vector<1x128xf32> to vector<8x128xf32>
    %5 = arith.addf %2, %4 : vector<8x128xf32>
    %cst_5 = arith.constant 0.000000e+00 : f32
    %6 = vector.broadcast %cst_5 : f32 to vector<8x128xf32>
    %7 = arith.maximumf %5, %6 : vector<8x128xf32>
    %c0_6 = arith.constant 0 : index
    %c0_7 = arith.constant 0 : index
    %8 = vector.load %arg4[%c0_6, %c0_7] : memref<128x128xf32, #tpu.memory_space<vmem>>, vector<128x128xf32>
    %cst_8 = arith.constant dense<0.000000e+00> : vector<8x128xf32>
    %9 = tpu.matmul %7, %8, %cst_8 {dimension_numbers = #tpu.dot_dimension_numbers<[1], [0], [0], [1], [0, 0, 1, 1], [], []>} : vector<8x128xf32>, vector<128x128xf32>, vector<8x128xf32> -> vector<8x128xf32>
    %c0_9 = arith.constant 0 : index
    %c0_10 = arith.constant 0 : index
    %10 = vector.load %arg5[%c0_9, %c0_10] : memref<1x128xf32, #tpu.memory_space<vmem>>, vector<1x128xf32>
    %11 = vector.broadcast %10 : vector<1x128xf32> to vector<8x128xf32>
    %12 = arith.addf %9, %11 : vector<8x128xf32>
    %cst_11 = arith.constant 0.000000e+00 : f32
    %13 = vector.broadcast %cst_11 : f32 to vector<8x128xf32>
    %14 = arith.maximumf %12, %13 : vector<8x128xf32>
    %c0_12 = arith.constant 0 : index
    %c0_13 = arith.constant 0 : index
    %15 = vector.load %arg6[%c0_12, %c0_13] : memref<128x128xf32, #tpu.memory_space<vmem>>, vector<128x128xf32>
    %cst_14 = arith.constant dense<0.000000e+00> : vector<8x128xf32>
    %16 = tpu.matmul %14, %15, %cst_14 {dimension_numbers = #tpu.dot_dimension_numbers<[1], [0], [0], [1], [0, 0, 1, 1], [], []>} : vector<8x128xf32>, vector<128x128xf32>, vector<8x128xf32> -> vector<8x128xf32>
    %c0_15 = arith.constant 0 : index
    %c0_16 = arith.constant 0 : index
    %17 = vector.load %arg7[%c0_15, %c0_16] : memref<1x128xf32, #tpu.memory_space<vmem>>, vector<1x128xf32>
    %18 = vector.broadcast %17 : vector<1x128xf32> to vector<8x128xf32>
    %19 = arith.addf %16, %18 : vector<8x128xf32>
    %c0_17 = arith.constant 0 : index
    %c0_18 = arith.constant 0 : index
    %20 = vector.load %arg8[%c0_17, %c0_18] : memref<8x128xf32, #tpu.memory_space<vmem>>, vector<8x128xf32>
    tpu.vector_store %arg8[%c0_17, %c0_18], %19 {strides = array<i32>} : memref<8x128xf32, #tpu.memory_space<vmem>>, vector<8x128xf32>,
    return
  }
  func.func @transform_0(%arg0: i32) -> (i32, i32) {
    %c0_i32 = arith.constant 0 : i32
    %c0_i32_0 = arith.constant 0 : i32
    return %arg0, %c0_i32 : i32, i32
  }
  func.func @transform_1(%arg0: i32) -> (i32, i32) {
    %c0_i32 = arith.constant 0 : i32
    %c0_i32_0 = arith.constant 0 : i32
    %c0_i32_1 = arith.constant 0 : i32
    return %c0_i32, %c0_i32_0 : i32, i32
  }
  func.func @transform_2(%arg0: i32) -> (i32, i32) {
    %c0_i32 = arith.constant 0 : i32
    %c0_i32_0 = arith.constant 0 : i32
    %c0_i32_1 = arith.constant 0 : i32
    return %c0_i32, %c0_i32_0 : i32, i32
  }
  func.func @transform_3(%arg0: i32) -> (i32, i32) {
    %c0_i32 = arith.constant 0 : i32
    %c0_i32_0 = arith.constant 0 : i32
    %c0_i32_1 = arith.constant 0 : i32
    return %c0_i32, %c0_i32_0 : i32, i32
  }
  func.func @transform_4(%arg0: i32) -> (i32, i32) {
    %c0_i32 = arith.constant 0 : i32
    %c0_i32_0 = arith.constant 0 : i32
    %c0_i32_1 = arith.constant 0 : i32
    return %c0_i32, %c0_i32_0 : i32, i32
  }
  func.func @transform_5(%arg0: i32) -> (i32, i32) {
    %c0_i32 = arith.constant 0 : i32
    %c0_i32_0 = arith.constant 0 : i32
    %c0_i32_1 = arith.constant 0 : i32
    return %c0_i32, %c0_i32_0 : i32, i32
  }
  func.func @transform_6(%arg0: i32) -> (i32, i32) {
    %c0_i32 = arith.constant 0 : i32
    %c0_i32_0 = arith.constant 0 : i32
    %c0_i32_1 = arith.constant 0 : i32
    return %c0_i32, %c0_i32_0 : i32, i32
  }
  func.func @transform_7(%arg0: i32) -> (i32, i32) {
    %c0_i32 = arith.constant 0 : i32
    %c0_i32_0 = arith.constant 0 : i32
    return %arg0, %c0_i32 : i32, i32
  }
}

</mosaic_0001>

<bundles_post_ra>
// kernel: tpu_custom_call.1
= control target key start
LH: loop header
LB: loop body
LE: loop exit
PB: predicated region body
PF: predicated region fallthrough
CT: control target
= control target key end

     0   :  { %12 = vsyncpa [#allocation3], 0  ;;  %s1614_s0 = inlined_call_operand.hbm [shape: f32[16,128], index: 0, kind: input, shape index: {}]   ;;  %s1615_s1 = inlined_call_operand.hbm [shape: f32[128,128], index: 1, kind: input, shape index: {}]   ;;  %s1616_s2 = inlined_call_operand.vmem [shape: f32[1,128], index: 2, kind: input, shape index: {}]   ;;  %s1617_s3 = inlined_call_operand.hbm [shape: f32[128,128], index: 3, kind: input, shape index: {}]   ;;  %s1618_s4 = inlined_call_operand.vmem [shape: f32[1,128], index: 4, kind: input, shape index: {}]   ;;  %s1619_s5 = inlined_call_operand.hbm [shape: f32[128,128], index: 5, kind: input, shape index: {}]   ;;  %s1620_s6 = inlined_call_operand.vmem [shape: f32[1,128], index: 6, kind: input, shape index: {}]   ;;  %s1621_s7 = inlined_call_operand.hbm [shape: f32[16,128], index: 7, kind: output, shape index: {}]  }
   0x1   :  { %14 = vsyncpa [#allocation3 + $0x1], 0 }
   0x2   :  { %15 = vsyncpa [#allocation6], 0 }
   0x3   :  { %16 = vsyncpa [#allocation9], 0 }
   0x4   :  { %17 = vsyncpa [#allocation4], 0 }
   0x5   :  { %19 = vsyncpa [#allocation4 + $0x1], 0  ;;  %s1305_s24 = smov 0   ;;  %s1307_s25 = smov 0  }
   0x6   :  { %s1309_s26 = smov 0   ;;  %s1311_s27 = smov 0  }
   0x7 LB: > { %s1326_s28 = sadd.s32 4294967295, %s1253_s27   ;;  %s734_s29 = sadd.s32 4294967294, %s1253_s27   ;;  %s1253_s27 = sphi %s1311_s27, %s1647_s27   ;;  %s1249_s26 = sphi %s1309_s26, %s1646_s26   ;;  %s1245_s25 = sphi %s1307_s25, %s1645_s25   ;;  %s1241_s24 = sphi %s1305_s24, %s1644_s24  }
   0x8   : > { %p45_p0 = scmp.ne.s32.totalorder %s1245_s25, %s1241_s24  ;;  %p1622_p1 = scmp.eq.s32.totalorder %s1326_s28, 0 }
   0x9   : > { %p201_p3 = scmp.eq.s32.totalorder %s734_s29, 1  ;;  %p735_p5 = scmp.ge.s32.totalorder %s1253_s27, 1 }
   0xa   : > { %p1335_p4 = por %p1622_p1, %p45_p0  ;;  %p208_p7 = scmp.lt.s32.totalorder %s1253_s27, 3 }
   0xb   : > { %p1340_p6 = por %p201_p3, %p45_p0  ;;  %s1255_s10 = smov [#allocation5]  }
   0xc   : > { %s1626_s30 = scalar_select %p1335_p4, 1, 0 }
   0xd   : > { %s1627_s8 = scalar_select %p1340_p6, 1, 0 }
   0xe   : > { %p1345_p8 = pnand %p735_p5, %p208_p7  ;;  %s220_s11 = sshll.u32 %s1255_s10, 4  ;;  %s1349_s11 = int_to_ptr.vmem [resolvable:$true] %s220_s11 }
   0xf   : > { %1628 = sst [smem:[#allocation15_spill]] %s1627_s8  ;;  %s1256_s13 = smov [#allocation7]  }
  0x10   : > { %s1629_s9 = scalar_select %p1345_p8, 1, 0 }
  0x11   : > { %p999_p9 = pneg %p1345_p8  ;;  %s236_s14 = sshll.u32 %s1256_s13, 4  ;;  %s1360_s14 = int_to_ptr.vmem [resolvable:$true] %s236_s14 }
  0x12   : > { %s1257_s15 = smov [#allocation8]   ;;  %s1065_s19 = scalar_lea.hbm %s1615_s1, 2048 }
  0x13   : > { %p1356_p11 = pnand %p999_p9, %p1622_p1  ;;  %s1362_s16 = sshll.u32 %s1257_s15, 4  ;;  %s253_s16 = int_to_ptr.vmem [resolvable:$true] %s1362_s16 }
  0x14   : > { %p1066_p12 = scmp.ne.s32.totalorder %s1615_s1, %s1065_s19  ;;  %p1072_p5 = scmp.lt.u32.totalorder %s1065_s19, %s1615_s1 }
  0x15   : > { %p1372_p13 = pneg %p1356_p11 }
  0x17   : > { %p1068_p0 = pnand %p1372_p13, %p1066_p12 }
  0x19   : > { %p1069_p3 = pneg %p1068_p0 }
  0x1b   : > { %p1074_p7 = pnand %p1072_p5, %p1069_p3 }
  0x1d   : > { %1077 = shalt.err (!%p1074_p7)
}
  0x1e   : > { %s1078_s10 = scalar_lea.vmem %s1349_s11, 2048  ;;  %p1086_p2 = scmp.lt.s32.totalorder %s1349_s11, %s1349_s11 }
  0x1f   : > { %p1079_p9 = scmp.ne.s32.totalorder %s1349_s11, %s1078_s10  ;;  %p1087_p6 = scmp.lt.s32.totalorder %s1078_s10, %s1078_s10 }
  0x21   : > { %p1081_p10 = pnand %p1079_p9, %p1372_p13  ;;  %p1088_p12 = por %p1087_p6, %p1086_p2 }
  0x23   : > { %p1082_p1 = pneg %p1081_p10 }
  0x25   : > { %p1089_p0 = pnand %p1088_p12, %p1082_p1 }
  0x27   : > { %1092 = shalt.err (!%p1089_p0)
}
  0x28   : > { %s1258_s13 = smov 128   ;;  %s1259_s15 = smov 8  }
  0x29   : > { %1002 = dma.hbm_to_vmem [thread:$0]  (!%p1356_p11), %s1615_s1, 2048, %s1349_s11, [#allocation6], %s1258_s13, %s1258_s13, %s1259_s15  }
  0x2a   : > { %s1093_s21 = scalar_lea.hbm %s1617_s3, 2048 }
  0x2b   : > { %p1094_p1 = scmp.ne.s32.totalorder %s1617_s3, %s1093_s21  ;;  %p1100_p10 = scmp.lt.u32.totalorder %s1093_s21, %s1617_s3 }
  0x2d   : > { %p1096_p2 = pnand %p1094_p1, %p1372_p13 }
  0x2f   : > { %p1097_p6 = pneg %p1096_p2 }
  0x31   : > { %p1102_p3 = pnand %p1100_p10, %p1097_p6 }
  0x33   : > { %1105 = shalt.err (!%p1102_p3)
}
  0x34   : > { %s1106_s11 = scalar_lea.vmem %s1360_s14, 2048  ;;  %p1114_p12 = scmp.lt.s32.totalorder %s1360_s14, %s1360_s14 }
  0x35   : > { %p1107_p5 = scmp.ne.s32.totalorder %s1360_s14, %s1106_s11  ;;  %p1115_p0 = scmp.lt.s32.totalorder %s1106_s11, %s1106_s11 }
  0x37   : > { %p1109_p7 = pnand %p1107_p5, %p1372_p13  ;;  %p1116_p1 = por %p1115_p0, %p1114_p12 }
  0x39   : > { %p1110_p9 = pneg %p1109_p7 }
  0x3b   : > { %p1117_p2 = pnand %p1116_p1, %p1110_p9 }
  0x3d   : > { %1120 = shalt.err (!%p1117_p2)
}
  0x3e   : > { %1005 = dma.hbm_to_vmem [thread:$0]  (!%p1356_p11), %s1617_s3, 2048, %s1360_s14, [#allocation6], %s1258_s13, %s1258_s13, %s1259_s15  }
  0x3f   : > { %s1121_s20 = scalar_lea.hbm %s1619_s5, 2048 }
  0x40   : > { %p1122_p6 = scmp.ne.s32.totalorder %s1619_s5, %s1121_s20  ;;  %p1128_p5 = scmp.lt.u32.totalorder %s1121_s20, %s1619_s5 }
  0x42   : > { %p1124_p10 = pnand %p1122_p6, %p1372_p13 }
  0x44   : > { %p1125_p3 = pneg %p1124_p10 }
  0x46   : > { %p1130_p7 = pnand %p1128_p5, %p1125_p3 }
  0x48   : > { %1133 = shalt.err (!%p1130_p7)
}
  0x49   : > { %s1134_s11 = scalar_lea.vmem %s253_s16, 2048  ;;  %p1142_p1 = scmp.lt.s32.totalorder %s253_s16, %s253_s16 }
  0x4a   : > { %p1135_p9 = scmp.ne.s32.totalorder %s253_s16, %s1134_s11  ;;  %p1143_p2 = scmp.lt.s32.totalorder %s1134_s11, %s1134_s11 }
  0x4c   : > { %p1137_p12 = pnand %p1135_p9, %p1372_p13  ;;  %p1144_p4 = por %p1143_p2, %p1142_p1 }
  0x4e   : > { %p1138_p0 = pneg %p1137_p12 }
  0x50   : > { %p1145_p8 = pnand %p1144_p4, %p1138_p0 }
  0x52   : > { %1148 = shalt.err (!%p1145_p8)
}
  0x53   : > { %1008 = dma.hbm_to_vmem [thread:$0]  (!%p1356_p11), %s1619_s5, 2048, %s253_s16, [#allocation9], %s1258_s13, %s1258_s13, %s1259_s15  }
  0x54   : > { %s1445_s22 = sadd.s32 1, %s1253_s27   ;;  %s32_s17 = sadd.s32 1, %s1249_s26 }
  0x55   : > { %s29_s12 = ssub.s32 %s1253_s27, %s1445_s22  ;;  %p39_p8 = scmp.ne.s32.totalorder %s1249_s26, %s1245_s25 }
  0x56   : > { %p30_p4 = scmp.eq.s32.totalorder %s29_s12, 0  ;;  %p40_p13 = scmp.eq.s32.totalorder %s1253_s27, 0 }
  0x57   : > { %p1020_p6 = scmp.lt.s32.totalorder %s1253_s27, 2  ;;  %p1632_p3 = scmp.eq.s32.totalorder %s1326_s28, 1 }
  0x58   : > { %s1455_s18 = scalar_select %p30_p4, %s1249_s26, %s32_s17  }
  0x59   : > { %p41_p10 = por %p40_p13, %p39_p8  ;;  %p1459_p5 = por %p1632_p3, %p39_p8 }
  0x5a   : > { %s269_s20 = sand.u32 1, %s1249_s26   ;;  %s741_s21 = sshll.u32 %s1253_s27, 7 }
  0x5b   : > { %s740_s16 = sshll.u32 %s269_s20, 3  ;;  %s1468_s23 = scalar_lea.hbm %s1614_s0, %s741_s21 }
  0x5c   : > { %s273_s29 = scalar_lea.vmem [#allocation2], %s740_s16  ;;  %p1470_p11 = pnand %p1020_p6, %p41_p10 }
  0x5d   : > { %s280_s10 = sshll.u32 %s273_s29, 4  ;;  %s270_s14 = scalar_lea.sflag [#allocation3], %s269_s20  ;;  %s1474_s10 = int_to_ptr.vmem [resolvable:$true] %s280_s10 }
  0x5e   : > { %s1149_s8 = scalar_lea.hbm %s1468_s23, 128  ;;  %p1151_p9 = pneg %p1470_p11 }
  0x5f   : > { %p1150_p7 = scmp.ne.s32.totalorder %s1468_s23, %s1149_s8  ;;  %s1154_s21 = scalar_lea.hbm %s1614_s0, 256 }
  0x60   : > { %p1155_p1 = scmp.lt.u32.totalorder %s1468_s23, %s1614_s0  ;;  %p1156_p2 = scmp.lt.u32.totalorder %s1154_s21, %s1149_s8 }
  0x61   : > { %p1152_p12 = pnand %p1151_p9, %p1150_p7  ;;  %p1158_p8 = scmp.lt.u32.totalorder %s1149_s8, %s1468_s23 }
  0x62   : > { %p1157_p4 = por %p1156_p2, %p1155_p1 }
  0x63   : > { %p1153_p0 = pneg %p1152_p12 }
  0x64   : > { %p1159_p13 = por %p1158_p8, %p1157_p4 }
  0x66   : > { %p1160_p6 = pnand %p1159_p13, %p1153_p0 }
  0x68   : > { %1163 = shalt.err (!%p1160_p6)
}
  0x69   : > { %s1164_s20 = scalar_lea.vmem %s1474_s10, 128  ;;  %s1260_s15 = smov [#allocation2]  }
  0x6a   : > { %p1165_p10 = scmp.ne.s32.totalorder %s1474_s10, %s1164_s20  ;;  %s1169_s29 = sshll.u32 %s1260_s15, 4  ;;  %s1170_s29 = int_to_ptr.vmem [resolvable:$false] %s1169_s29 }
  0x6b   : > { %s1171_s12 = scalar_lea.vmem %s1170_s29, 256  ;;  %p1172_p12 = scmp.lt.s32.totalorder %s1474_s10, %s1170_s29 }
  0x6c   : > { %p1167_p3 = pnand %p1165_p10, %p1151_p9  ;;  %p1173_p1 = scmp.lt.s32.totalorder %s1171_s12, %s1164_s20 }
  0x6e   : > { %p1168_p7 = pneg %p1167_p3  ;;  %p1174_p2 = por %p1173_p1, %p1172_p12 }
  0x70   : > { %p1175_p4 = pnand %p1174_p2, %p1168_p7 }
  0x72   : > { %1178 = shalt.err (!%p1175_p4)
}
  0x73   : > { %1012 = dma.hbm_to_vmem [thread:$0]  (!%p1470_p11), %s1468_s23, 128, %s1474_s10, %s270_s14  }
  0x74   : > { %p1635_p0 = scmp.ne.s32.totalorder %s1629_s9, 0 }
  0x75   : > { %s1504_s8 = sand.u32 (!%p1635_p0), 1, %s1245_s25   ;;  %p1636_p9 = scmp.ne.s32.totalorder (!%p1635_p0), %s1626_s30, 0 }
  0x76   : > { %289 = sbr.rel (%p1635_p0) target bundleno = 828 (0x33c), region = 48  ;;  %s743_s17 = sshll.u32 (!%p1635_p0), %s1504_s8, 3 }
  0x77   : > { %s292_s21 = scalar_lea.sflag (!%p1635_p0), [#allocation3], %s1504_s8  ;;  %s1510_s16 = scalar_lea.vmem (!%p1635_p0), [#allocation2], %s743_s17 }
  0x7d   : > { %1224 = dma.done.wait (%p1636_p9), %s292_s21, 128  }
  0x7e   : > { %1226 = vsyncadd (%p1636_p9), %s292_s21, 4294967168  ;;  %p1637_p11 = scmp.eq.s32.totalorder %s1326_s28, 0 }
  0x80   : > { %1228 = dma.done.wait (%p1637_p11), [#allocation6], 4096   ;;  %p1638_p8 = pmov %p1637_p11 }
  0x82   : > { %1230 = vsyncadd (%p1638_p8), [#allocation6], 4294963200  ;;  %p1639_p13 = pmov %p1638_p8 }
  0x83   : > { %p1640_p6 = pmov %p1638_p8 }
  0x84   : > { %1232 = dma.done.wait (%p1639_p13), [#allocation9], 2048  }
  0x85   : > { %1234 = vsyncadd (%p1640_p6), [#allocation9], 4294965248  ;;  %v1261_v0 = vmov 0.0|0.0   ;;  %vm1262_vm0 = vmmov 0   ;;  %v1263_v1 = vmov 0.0   ;;  %v339_v2 = vld [vmem:[#allocation5] sm:$0xff] }
  0x86   : > { %911 = vmatprep.subr.bf16.mxu0 %v1261_v0  ;;  %838 = vmatprep.mubr.msk.f32.mxu0 %vm1262_vm0, %v1263_v1  ;;  %v340_v3 = vld [vmem:[#allocation5 + $0x8] sm:$0xff]  ;;  %v341_v4 = vld [vmem:[#allocation5 + $0x10] sm:$0xff]  ;;  %v342_v6 = vld [vmem:[#allocation5 + $0x18] sm:$0xff]  ;;  %s752_s13 = sshll.u32 %s1326_s28, 7  ;;  %s337_s20 = scalar_lea.vmem [#allocation10], %s743_s17 }
  0x87   : > { %935 = vmatprep.subr.bf16.mxu1 %v1261_v0  ;;  %873 = vmatprep.mubr.msk.f32.mxu1 %vm1262_vm0, %v1263_v1  ;;  %v912_v5 = vpack.c.bf16 %v340_v3, %v339_v2  ;;  %v915_v7 = vpack.c.bf16 %v342_v6, %v341_v4  ;;  %v343_v8 = vld [vmem:[#allocation5 + $0x20] sm:$0xff]  ;;  %v344_v9 = vld [vmem:[#allocation5 + $0x28] sm:$0xff]  ;;  %v435_v12 = vld [vmem:[#allocation7 + $0x10] sm:$0xff]  ;;  %s635_s15 = sshll.u32 %s337_s20, 4  ;;  %s1570_s21 = scalar_lea.hbm %s1621_s7, %s752_s13  ;;  %s1572_s15 = int_to_ptr.vmem [resolvable:$true] %s635_s15 }
  0x88   : > { %v433_v10 = vld [vmem:[#allocation7] sm:$0xff]  ;;  %v434_v11 = vld [vmem:[#allocation7 + $0x8] sm:$0xff]  ;;  %v436_v13 = vld [vmem:[#allocation7 + $0x18] sm:$0xff]  ;;  %v918_v14 = vpack.c.bf16 %v344_v9, %v343_v8  ;;  %s1179_s30 = scalar_lea.vmem %s1572_s15, 128  ;;  %s1264_s28 = smov [#allocation10]  }
  0x89   : > { %913 = vmatpush3.bf16.msra.mxu0 %v912_v5  ;;  %v936_v15 = vpack.c.bf16 %v434_v11, %v433_v10  ;;  %v345_v16 = vld [vmem:[#allocation5 + $0x30] sm:$0xff]  ;;  %v346_v17 = vld [vmem:[#allocation5 + $0x38] sm:$0xff]  ;;  %v939_v18 = vpack.c.bf16 %v436_v13, %v435_v12  ;;  %v437_v19 = vld [vmem:[#allocation7 + $0x20] sm:$0xff]  ;;  %p1180_p10 = scmp.ne.s32.totalorder %s1572_s15, %s1179_s30  ;;  %s1183_s17 = sshll.u32 %s1264_s28, 4  ;;  %s1184_s17 = int_to_ptr.vmem [resolvable:$false] %s1183_s17 }
  0x8a   : > { %914 = vmatprep.subr.bf16.mxu0 %v1261_v0  ;;  %v438_v20 = vld [vmem:[#allocation7 + $0x28] sm:$0xff]  ;;  %v921_v21 = vpack.c.bf16 %v346_v17, %v345_v16  ;;  %v347_v22 = vld [vmem:[#allocation5 + $0x40] sm:$0xff]  ;;  %v439_v25 = vld [vmem:[#allocation7 + $0x30] sm:$0xff]  ;;  %s1185_s9 = scalar_lea.vmem %s1184_s17, 256  ;;  %p1186_p12 = scmp.lt.s32.totalorder %s1572_s15, %s1184_s17 }
  0x8b   : > { %937 = vmatpush3.bf16.msra.mxu1 %v936_v15  ;;  %v348_v23 = vld [vmem:[#allocation5 + $0x48] sm:$0xff]  ;;  %v942_v24 = vpack.c.bf16 %v438_v20, %v437_v19  ;;  %v440_v26 = vld [vmem:[#allocation7 + $0x38] sm:$0xff]  ;;  %v349_v28 = vld [vmem:[#allocation5 + $0x50] sm:$0xff]  ;;  %p1181_p3 = pnand %p1180_p10, %p1459_p5  ;;  %p1187_p1 = scmp.lt.s32.totalorder %s1185_s9, %s1179_s30 }
  0x8c   : > { %938 = vmatprep.subr.bf16.mxu1 %v1261_v0  ;;  %v924_v27 = vpack.c.bf16 %v348_v23, %v347_v22  ;;  %v350_v29 = vld [vmem:[#allocation5 + $0x58] sm:$0xff]  ;;  %v945_v30 = vpack.c.bf16 %v440_v26, %v439_v25  ;;  %v441_v31 = vld [vmem:[#allocation7 + $0x40] sm:$0xff]  ;;  %v442_v32 = vld [vmem:[#allocation7 + $0x48] sm:$0xff] }
  0x8d   : > { %916 = vmatpush3.bf16.msra.mxu0 %v915_v7  ;;  %v927_v33 = vpack.c.bf16 %v350_v29, %v349_v28  ;;  %v351_v34 = vld [vmem:[#allocation5 + $0x60] sm:$0xff]  ;;  %v352_v35 = vld [vmem:[#allocation5 + $0x68] sm:$0xff]  ;;  %v948_v36 = vpack.c.bf16 %v442_v32, %v441_v31  ;;  %v443_v37 = vld [vmem:[#allocation7 + $0x50] sm:$0xff]  ;;  %p1182_p7 = pneg %p1181_p3  ;;  %p1188_p2 = por %p1187_p1, %p1186_p12 }
  0x8e   : > { %917 = vmatprep.subr.bf16.mxu0 %v1261_v0  ;;  %v444_v38 = vld [vmem:[#allocation7 + $0x58] sm:$0xff]  ;;  %v930_v39 = vpack.c.bf16 %v352_v35, %v351_v34  ;;  %v353_v40 = vld [vmem:[#allocation5 + $0x70] sm:$0xff]  ;;  %v445_v43 = vld [vmem:[#allocation7 + $0x60] sm:$0xff] }
  0x8f   : > { %940 = vmatpush3.bf16.msra.mxu1 %v939_v18  ;;  %v354_v41 = vld [vmem:[#allocation5 + $0x78] sm:$0xff]  ;;  %v951_v42 = vpack.c.bf16 %v444_v38, %v443_v37  ;;  %v446_v44 = vld [vmem:[#allocation7 + $0x68] sm:$0xff]  ;;  %v447_v48 = vld [vmem:[#allocation7 + $0x70] sm:$0xff]  ;;  %p1189_p4 = pnand %p1188_p2, %p1182_p7 }
  0x90   : > { %941 = vmatprep.subr.bf16.mxu1 %v1261_v0  ;;  %v933_v45 = vpack.c.bf16 %v354_v41, %v353_v40  ;;  %v954_v46 = vpack.c.bf16 %v446_v44, %v445_v43  ;;  %v338_v47 = vld [vmem:[%s1510_s16] sm:$0xff]  ;;  %v527_v51 = vld [vmem:[#allocation8] sm:$0xff]  ;;  %v528_v52 = vld [vmem:[#allocation8 + $0x8] sm:$0xff]  ;;  %s622_s16 = scalar_lea.sflag [#allocation4], %s1504_s8 }
  0x91   : > { %919 = vmatpush3.bf16.msra.mxu0 %v918_v14  ;;  %v448_v49 = vld [vmem:[#allocation7 + $0x78] sm:$0xff]  ;;  %v529_v53 = vld [vmem:[#allocation8 + $0x10] sm:$0xff]  ;;  %v960_v54 = vpack.c.bf16 %v528_v52, %v527_v51  ;;  %v531_v57 = vld [vmem:[#allocation8 + $0x20] sm:$0xff] }
  0x92   : > { %920 = vmatprep.subr.bf16.mxu0 %v1261_v0  ;;  %v957_v50 = vpack.c.bf16 %v448_v49, %v447_v48  ;;  %v530_v55 = vld [vmem:[#allocation8 + $0x18] sm:$0xff]  ;;  %v532_v58 = vld [vmem:[#allocation8 + $0x28] sm:$0xff]  ;;  %v533_v60 = vld [vmem:[#allocation8 + $0x30] sm:$0xff] }
  0x93   : > { %943 = vmatpush3.bf16.msra.mxu1 %v942_v24  ;;  %v963_v56 = vpack.c.bf16 %v530_v55, %v529_v53  ;;  %v966_v59 = vpack.c.bf16 %v532_v58, %v531_v57  ;;  %v534_v61 = vld [vmem:[#allocation8 + $0x38] sm:$0xff]  ;;  %v535_v63 = vld [vmem:[#allocation8 + $0x40] sm:$0xff]  ;;  %v537_v3 = vld [vmem:[#allocation8 + $0x50] sm:$0xff] }
  0x94   : > { %944 = vmatprep.subr.bf16.mxu1 %v1261_v0  ;;  %v969_v62 = vpack.c.bf16 %v534_v61, %v533_v60  ;;  %v538_v4 = vld [vmem:[#allocation8 + $0x58] sm:$0xff]  ;;  %v539_v6 = vld [vmem:[#allocation8 + $0x60] sm:$0xff]  ;;  %v540_v7 = vld [vmem:[#allocation8 + $0x68] sm:$0xff] }
  0x95   : > { %922 = vmatpush3.bf16.msra.mxu0 %v921_v21  ;;  %v975_v5 = vpack.c.bf16 %v538_v4, %v537_v3  ;;  %v978_v8 = vpack.c.bf16 %v540_v7, %v539_v6  ;;  %v748_v9 = vld [vmem:[%s1616_s2] ss:$0 sm:$0xff]  ;;  %v542_v15 = vld [vmem:[#allocation8 + $0x78] sm:$0xff] }
  0x96   : > { %923 = vmatprep.subr.bf16.mxu0 %v1261_v0  ;;  %v541_v14 = vld [vmem:[#allocation8 + $0x70] sm:$0xff] }
  0x97   : > { %946 = vmatpush3.bf16.msra.mxu1 %v945_v30  ;;  %v981_v16 = vpack.c.bf16 %v542_v15, %v541_v14  ;;  %v749_v17 = vld [vmem:[%s1618_s4] ss:$0 sm:$0xff] }
  0x98   : > { %947 = vmatprep.subr.bf16.mxu1 %v1261_v0  ;;  %v750_v21 = vld [vmem:[%s1620_s6] ss:$0 sm:$0xff] }
  0x99   : > { %925 = vmatpush3.bf16.msra.mxu0 %v924_v27 }
  0x9a   : > { %926 = vmatprep.subr.bf16.mxu0 %v1261_v0 }
  0x9b   : > { %949 = vmatpush3.bf16.msra.mxu1 %v948_v36 }
  0x9c   : > { %950 = vmatprep.subr.bf16.mxu1 %v1261_v0 }
  0x9d   : > { %928 = vmatpush3.bf16.msra.mxu0 %v927_v33 }
  0x9e   : > { %929 = vmatprep.subr.bf16.mxu0 %v1261_v0 }
  0x9f   : > { %952 = vmatpush3.bf16.msra.mxu1 %v951_v42 }
  0xa0   : > { %953 = vmatprep.subr.bf16.mxu1 %v1261_v0 }
  0xa1   : > { %931 = vmatpush3.bf16.msra.mxu0 %v930_v39 }
  0xa2   : > { %932 = vmatprep.subr.bf16.mxu0 %v1261_v0 }
  0xa3   : > { %955 = vmatpush3.bf16.msra.mxu1 %v954_v46 }
  0xa4   : > { %956 = vmatprep.subr.bf16.mxu1 %v1261_v0 }
  0xa5   : > { %934 = vmatpush3.bf16.msra.mxu0 %v933_v45 }
  0xa6   : > { %959 = vmatprep.subr.bf16.mxu0 %v1261_v0 }
  0xa7   : > { %958 = vmatpush3.bf16.msra.mxu1 %v957_v50 }
  0xa8   : > { %839 = vmatmul.mubr.f32.vlgmr.msra.gmra.mrb[0].mxu0 %v338_v47 }
  0xa9   : > { %908 = vmatprep.mubr.msk.f32.mxu0 %vm1262_vm0, %v1263_v1  ;;  %961 = vmatpush3.bf16.msra.mxu0 %v960_v54  ;;  %v536_v1 = vld [vmem:[#allocation8 + $0x48] sm:$0xff] }
  0xaa   : > { %962 = vmatprep.subr.bf16.mxu0 %v1261_v0  ;;  %v972_v2 = vpack.c.bf16 %v536_v1, %v535_v63 }
  0xad   : > { %964 = vmatpush3.bf16.msra.mxu0 %v963_v56 }
  0xae   : > { %965 = vmatprep.subr.bf16.mxu0 %v1261_v0 }
  0xb1   : > { %967 = vmatpush3.bf16.msra.mxu0 %v966_v59 }
  0xb2   : > { %968 = vmatprep.subr.bf16.mxu0 %v1261_v0 }
  0xb5   : > { %970 = vmatpush3.bf16.msra.mxu0 %v969_v62 }
  0xb6   : > { %971 = vmatprep.subr.bf16.mxu0 %v1261_v0 }
  0xb9   : > { %973 = vmatpush3.bf16.msra.mxu0 %v972_v2 }
  0xba   : > { %974 = vmatprep.subr.bf16.mxu0 %v1261_v0 }
  0xbd   : > { %976 = vmatpush3.bf16.msra.mxu0 %v975_v5 }
  0xbe   : > { %977 = vmatprep.subr.bf16.mxu0 %v1261_v0 }
  0xc1   : > { %979 = vmatpush3.bf16.msra.mxu0 %v978_v8 }
  0xc2   : > { %980 = vmatprep.subr.bf16.mxu0 %v1261_v0 }
  0xc5   : > { %982 = vmatpush3.bf16.msra.mxu0 %v981_v16 }
 0x17b   : > { %v428_v10 = vpop.f32.mrb[0].mxu0 }
 0x17c   : > { %v429_v11 = vadd.f32 %v748_v9, %v428_v10  ;;  %v840_v12 = vpop.f32.mrb[1].mxu0 }
 0x17e   : > { %v432_v13 = vmax.f32 %v429_v11, 0.0 }
 0x180   : > { %874 = vmatmul.mubr.f32.vlgmr.msra.gmra.mrb[0].mxu1 %v432_v13 }
 0x253   : > { %v522_v0 = vpop.f32.mrb[0].mxu1 }
 0x254   : > { %v523_v18 = vadd.f32 %v749_v17, %v522_v0  ;;  %v875_v19 = vpop.f32.mrb[1].mxu1 }
 0x256   : > { %v526_v20 = vmax.f32 %v523_v18, 0.0 }
 0x258   : > { %909 = vmatmul.mubr.f32.vlgmr.msra.gmra.mrb[2].mxu0 %v526_v20 }
 0x32b   : > { %v616_v22 = vpop.f32.mrb[2].mxu0 }
 0x32c   : > { %v617_v23 = vadd.f32 %v750_v21, %v616_v22  ;;  %v910_v24 = vpop.f32.mrb[3].mxu0 }
 0x32e   : > { %620 = vst [vmem:[%s337_s20] sm:$0xff] %v617_v23 }
 0x32f   : > { %1192 = shalt.err (!%p1189_p4)
}
 0x330   : > { %s1193_s8 = scalar_lea.hbm %s1570_s21, 128  ;;  %s1197_s11 = scalar_lea.hbm %s1621_s7, 256 }
 0x331   : > { %p1194_p0 = scmp.ne.s32.totalorder %s1570_s21, %s1193_s8  ;;  %p1198_p8 = scmp.lt.u32.totalorder %s1570_s21, %s1621_s7 }
 0x332   : > { %p1199_p13 = scmp.lt.u32.totalorder %s1197_s11, %s1193_s8  ;;  %p1201_p10 = scmp.lt.u32.totalorder %s1193_s8, %s1570_s21 }
 0x333   : > { %p1195_p9 = pnand %p1194_p0, %p1459_p5 }
 0x334   : > { %p1200_p6 = por %p1199_p13, %p1198_p8 }
 0x335   : > { %p1196_p11 = pneg %p1195_p9 }
 0x336   : > { %p1202_p3 = por %p1201_p10, %p1200_p6 }
 0x338   : > { %p1203_p7 = pnand %p1202_p3, %p1196_p11 }
 0x33a   : > { %1206 = shalt.err (!%p1203_p7)
}
 0x33b   : > { %997 = dma.vmem_to_hbm [thread:$0]  (%p1459_p5), %s1572_s15, 128, %s1570_s21, %s622_s16  }
 0x33c PF: > { %s1641_s20 = sld [smem:[#allocation15_spill]]  ;;  %s647_s29 = sand.u32 1, %s1241_s24  }
 0x33d   : > { %p1643_p1 = scmp.ge.s32.totalorder %s1253_s27, 2  ;;  %s648_s12 = scalar_lea.sflag [#allocation4], %s647_s29 }
 0x342   : > { %p1642_p12 = scmp.ne.s32.totalorder %s1641_s20, 0 }
 0x344   : > { %p1014_p2 = pnand %p1643_p1, %p1642_p12 }
 0x346   : > { %1236 = dma.done.wait (!%p1014_p2), %s648_s12, 128  }
 0x347   : > { %1238 = vsyncadd (!%p1014_p2), %s648_s12, 4294967168  ;;  %p22_p4 = scmp.ge.s32.totalorder %s1445_s22, 4   ;;  %s1644_s24 = smov %s1245_s25 }
 0x348   : > { %s1645_s25 = smov %s1249_s26  ;;  %s1646_s26 = smov %s1455_s18 }
 0x349   : > { %s1647_s27 = smov %s1445_s22  ;;  %24 = sbr.rel (!%p22_p4) target bundleno = 7 (0x7), region = 105 }
 0x350   :  { %653 = vsyncpa [#allocation3], 1 }
 0x351   :  { %655 = vsyncpa [#allocation3 + $0x1], 1 }
 0x352   :  { %656 = vsyncpa [#allocation6], 1 }
 0x353   :  { %657 = vsyncpa [#allocation9], 1 }
 0x354   :  { %658 = vsyncpa [#allocation4], 1 }
 0x355   :  { %660 = vsyncpa [#allocation4 + $0x1], 1 }

</bundles_post_ra>
